<compile_context>
chip_gen: v7x
topology: tpu7x:2x2x1
jax: 0.10.0
libtpu: 0.0.40
codegen_flags: <defaults>
</compile_context>

<pallas_src>
import functools

import jax
import jax.numpy as jnp
from jax.experimental import pallas as pl
from jax.experimental.pallas import tpu as pltpu


def _batch_soft_iou_kernel(p_ref, l_ref, out_ref, inter_acc, sum_acc, *,
                           r_total, rows_chunk, mask_tail):
    """Grid: (num_batch_tiles [parallel], num_row_chunks [arbitrary]).

    p_ref, l_ref : (bn, rows_chunk, 128) VMEM tiles (sublane- and lane-dense)
    out_ref      : (bn, 1, 1) per-batch IoU, written on the last row chunk
    inter_acc    : (bn, 1, 128) f32 lane-wise partial sums of p * l
    sum_acc      : (bn, 1, 128) f32 lane-wise partial sums of p + l
    """
    k = pl.program_id(1)
    nk = pl.num_programs(1)

    @pl.when(k == 0)
    def _():
        inter_acc[...] = jnp.zeros_like(inter_acc)
        sum_acc[...] = jnp.zeros_like(sum_acc)

    # In-kernel cast: callers may feed bf16 / narrow dtypes to cut HBM bytes.
    p = p_ref[...].astype(jnp.float32)
    l = l_ref[...].astype(jnp.float32)

    def accumulate(pv, lv):
        # Per-chunk lane-wise partials: VPU multiplies/adds + a sublane reduce;
        # no cross-lane reduction in the hot loop.
        inter_acc[...] += jnp.sum(pv * lv, axis=1, keepdims=True)
        sum_acc[...] += (jnp.sum(pv, axis=1, keepdims=True)
                         + jnp.sum(lv, axis=1, keepdims=True))

    if mask_tail:
        # Only the last row chunk extends past the real row extent; keep the
        # iota/compare/select masking off the hot path by pl.when-gating it.
        @pl.when(k < nk - 1)
        def _():
            accumulate(p, l)

        @pl.when(k == nk - 1)
        def _():
            rows = (jax.lax.broadcasted_iota(jnp.int32, p.shape, 1)
                    + k * rows_chunk)
            valid = rows < r_total
            # jnp.where (not multiply-by-mask) so garbage OOB contents,
            # including NaN/Inf, contribute exactly zero.
            accumulate(jnp.where(valid, p, 0.0), jnp.where(valid, l, 0.0))
    else:
        accumulate(p, l)

    @pl.when(k == nk - 1)
    def _():
        inter = jnp.sum(inter_acc[...], axis=2, keepdims=True)           # (bn,1,1)
        union = jnp.sum(sum_acc[...], axis=2, keepdims=True) + jnp.float32(1e-5)
        out_ref[...] = (2.0 * inter / union).astype(out_ref.dtype)


def _default_budgets():
    """Return (per-input block bytes, scoped VMEM limit) tuned per chip."""
    try:
        info = pltpu.get_tpu_info()
        vmem = int(getattr(info, "vmem_capacity_bytes", 0) or 0)
    except Exception:  # not on TPU / API mismatch -> conservative defaults
        vmem = 0
    if vmem >= 96 * 1024 * 1024:
        # v5e / v6e: 128 MiB physical VMEM -> large blocks, raised scoped cap.
        return 8 * 1024 * 1024, 64 * 1024 * 1024
    # v7x (64 MiB physical VMEM) or unknown: 2 inputs x 2 buffers x 4 MiB
    # = 16 MiB of DMA buffers + f32 cast temps stays under the 32 MiB limit.
    return 4 * 1024 * 1024, 32 * 1024 * 1024


@functools.partial(jax.jit,
                   static_argnames=("target_block_bytes", "vmem_limit_bytes"))
def _batch_soft_iou_impl(probs, labels, *, target_block_bytes,
                         vmem_limit_bytes):
    bs = probs.shape[0]
    p = probs.reshape(bs, -1)
    l = labels.reshape(bs, -1)
    d = p.shape[1]

    # Lane padding only when D is not a multiple of 128 (uncommon); zero
    # padding contributes 0 to both intersection and union.
    d_pad = pl.cdiv(d, 128) * 128
    if d_pad != d:
        p = jnp.pad(p, ((0, 0), (0, d_pad - d)))
        l = jnp.pad(l, ((0, 0), (0, d_pad - d)))
    r = d_pad // 128
    p3 = p.reshape(bs, r, 128)   # free row-major split of the minor dim
    l3 = l.reshape(bs, r, 128)

    # Batch tile: keep >=2 iterations on the "parallel" grid axis whenever
    # bs >= 2 so v7x megacore uses both TensorCores (bs=2 -> bn=1, nb=2).
    if bs <= 1:
        bn = max(1, bs)
        # TODO(synk): for bs == 1 a parallel split of the reduction axis with
        # partial outputs would engage the second v7x TC; single-TC here.
    elif bs <= 8:
        bn = max(1, bs // 2)
    else:
        bn = 8

    # Row chunk sized so one input block is ~target_block_bytes (dtype-aware),
    # rounded to a multiple of 8 sublanes.
    itemsize = max(jnp.dtype(probs.dtype).itemsize,
                   jnp.dtype(labels.dtype).itemsize)
    rows = max(8, (target_block_bytes // (bn * 128 * itemsize)) // 8 * 8)
    rows_chunk = r if r <= rows else rows
    nb = pl.cdiv(bs, bn)
    nk = pl.cdiv(r, rows_chunk)
    mask_tail = (r % rows_chunk) != 0

    kernel = functools.partial(
        _batch_soft_iou_kernel,
        r_total=r, rows_chunk=rows_chunk, mask_tail=mask_tail)

    out = pl.pallas_call(
        kernel,
        out_shape=jax.ShapeDtypeStruct((bs, 1, 1), jnp.float32),
        grid_spec=pltpu.PrefetchScalarGridSpec(
            num_scalar_prefetch=0,
            grid=(nb, nk),
            in_specs=[
                pl.BlockSpec((bn, rows_chunk, 128), lambda b, k: (b, k, 0)),
                pl.BlockSpec((bn, rows_chunk, 128), lambda b, k: (b, k, 0)),
            ],
            out_specs=pl.BlockSpec((bn, 1, 1), lambda b, k: (b, 0, 0)),
            scratch_shapes=[
                pltpu.VMEM((bn, 1, 128), jnp.float32),
                pltpu.VMEM((bn, 1, 128), jnp.float32),
            ],
        ),
        compiler_params=pltpu.CompilerParams(
            dimension_semantics=("parallel", "arbitrary"),
            vmem_limit_bytes=vmem_limit_bytes,
        ),
    )(p3, l3)
    return out[:, 0, 0]


def batch_soft_iou(probs: jax.Array, labels: jax.Array, *,
                   target_block_bytes: int | None = None,
                   vmem_limit_bytes: int | None = None):
    """Pallas equivalent of BatchSoftIoU.forward: returns iou of shape (N,)."""
    blk_default, lim_default = _default_budgets()
    if target_block_bytes is None:
        target_block_bytes = blk_default
    if vmem_limit_bytes is None:
        vmem_limit_bytes = lim_default
    return _batch_soft_iou_impl(probs, labels,
                                target_block_bytes=int(target_block_bytes),
                                vmem_limit_bytes=int(vmem_limit_bytes))


def _reference(probs, labels):
    bs = probs.shape[0]
    p = probs.reshape(bs, -1).astype(jnp.float32)
    l = labels.reshape(bs, -1).astype(jnp.float32)
    inter = jnp.sum(p * l, axis=1)
    union = jnp.sum(p + l, axis=1) + 1e-5
    return 2.0 * inter / union


if __name__ == "__main__":
    key = jax.random.PRNGKey(0)
    k1, k2, k3, k4, k5, k6, k7, k8 = jax.random.split(key, 8)

    # --- Main demo: NCHW inputs, batch=2, channels=4, spatial=16x16 ---------
    logits = jax.random.normal(k1, (2, 4, 16, 16), dtype=jnp.float32)
    probs = jax.nn.sigmoid(logits)
    labels = (jax.random.uniform(k2, (2, 4, 16, 16)) > 0.5).astype(jnp.float32)

    iou = jax.block_until_ready(batch_soft_iou(probs, labels))
    ref = _reference(probs, labels)
    assert iou.shape == (2,)
    assert jnp.allclose(iou, ref, rtol=1e-5, atol=1e-6), (iou, ref)

    # --- Non-128-multiple D, multi-chunk grid + pl.when-gated tail mask -----
    p2 = jax.nn.sigmoid(jax.random.normal(k3, (2, 1300), dtype=jnp.float32))
    l2 = (jax.random.uniform(k4, (2, 1300)) > 0.5).astype(jnp.float32)
    iou2 = jax.block_until_ready(
        batch_soft_iou(p2, l2, target_block_bytes=4096))
    ref2 = _reference(p2, l2)
    assert jnp.allclose(iou2, ref2, rtol=1e-5, atol=1e-6), (iou2, ref2)

    # --- Ragged batch (bs=10, bn=8): last batch tile is partial --------------
    pr = jax.nn.sigmoid(jax.random.normal(k5, (10, 3, 8, 8), dtype=jnp.float32))
    lr = (jax.random.uniform(k6, (10, 3, 8, 8)) > 0.5).astype(jnp.float32)
    iou3 = jax.block_until_ready(batch_soft_iou(pr, lr))
    ref3 = _reference(pr, lr)
    assert iou3.shape == (10,)
    assert jnp.allclose(iou3, ref3, rtol=1e-5, atol=1e-6), (iou3, ref3)

    # --- Narrow dtype path: bf16 inputs (half the HBM bytes, cast in-kernel) -
    pb = jax.nn.sigmoid(
        jax.random.normal(k7, (2, 8, 32, 32))).astype(jnp.bfloat16)
    lb = (jax.random.uniform(k8, (2, 8, 32, 32)) > 0.5).astype(jnp.bfloat16)
    iou4 = jax.block_until_ready(batch_soft_iou(pb, lb))
    ref4 = _reference(pb, lb)
    assert jnp.allclose(iou4, ref4, rtol=1e-4, atol=1e-5), (iou4, ref4)

    print("KERNEL_OK")
</pallas_src>

<mosaic_0001>
module attributes {stable_mosaic.version = 11 : i64} {
  func.func @_batch_soft_iou_kernel(%arg0: i32, %arg1: i32, %arg2: memref<1x8x128xf32, #tpu.memory_space<vmem>>, %arg3: memref<1x8x128xf32, #tpu.memory_space<vmem>>, %arg4: memref<1x1x1xf32, #tpu.memory_space<vmem>>, %arg5: memref<1x1x128xf32, #tpu.memory_space<vmem>>, %arg6: memref<1x1x128xf32, #tpu.memory_space<vmem>>) attributes {dimension_semantics = [#tpu.dimension_semantics<parallel>, #tpu.dimension_semantics<arbitrary>], iteration_bounds = array<i64: 2, 1>, scalar_prefetch = 0 : i64, scratch_operands = 2 : i64, tpu.core_type = #tpu.core_type<tc>, window_params = [{transform_indices = @transform_0, window_bounds = array<i64: 1, 8, 128>}, {transform_indices = @transform_1, window_bounds = array<i64: 1, 8, 128>}, {transform_indices = @transform_2, window_bounds = array<i64: 1, 1, 1>}]} {
    %c0_i32 = arith.constant 0 : i32
    %0 = arith.cmpi eq, %arg1, %c0_i32 : i32
    %1 = arith.extui %0 : i1 to i32
    %c0_i32_0 = arith.constant 0 : i32
    %2 = arith.cmpi ne, %1, %c0_i32_0 : i32
    scf.if %2 {
      %cst_22 = arith.constant 0.000000e+00 : f32
      %22 = vector.broadcast %cst_22 : f32 to vector<1x1x128xf32>
      %c0_23 = arith.constant 0 : index
      %c0_24 = arith.constant 0 : index
      %c0_25 = arith.constant 0 : index
      %23 = vector.load %arg5[%c0_23, %c0_24, %c0_25] : memref<1x1x128xf32, #tpu.memory_space<vmem>>, vector<1x1x128xf32>
      tpu.vector_store %arg5[%c0_23, %c0_24, %c0_25], %22 {strides = array<i32>} : memref<1x1x128xf32, #tpu.memory_space<vmem>>, vector<1x1x128xf32>,
      %cst_26 = arith.constant 0.000000e+00 : f32
      %24 = vector.broadcast %cst_26 : f32 to vector<1x1x128xf32>
      %c0_27 = arith.constant 0 : index
      %c0_28 = arith.constant 0 : index
      %c0_29 = arith.constant 0 : index
      %25 = vector.load %arg6[%c0_27, %c0_28, %c0_29] : memref<1x1x128xf32, #tpu.memory_space<vmem>>, vector<1x1x128xf32>
      tpu.vector_store %arg6[%c0_27, %c0_28, %c0_29], %24 {strides = array<i32>} : memref<1x1x128xf32, #tpu.memory_space<vmem>>, vector<1x1x128xf32>,
    } else {
    }
    %c0 = arith.constant 0 : index
    %c0_1 = arith.constant 0 : index
    %c0_2 = arith.constant 0 : index
    %3 = vector.load %arg2[%c0, %c0_1, %c0_2] : memref<1x8x128xf32, #tpu.memory_space<vmem>>, vector<1x8x128xf32>
    %c0_3 = arith.constant 0 : index
    %c0_4 = arith.constant 0 : index
    %c0_5 = arith.constant 0 : index
    %4 = vector.load %arg3[%c0_3, %c0_4, %c0_5] : memref<1x8x128xf32, #tpu.memory_space<vmem>>, vector<1x8x128xf32>
    %c0_6 = arith.constant 0 : index
    %c0_7 = arith.constant 0 : index
    %c0_8 = arith.constant 0 : index
    %5 = vector.load %arg5[%c0_6, %c0_7, %c0_8] : memref<1x1x128xf32, #tpu.memory_space<vmem>>, vector<1x1x128xf32>
    %6 = arith.mulf %3, %4 : vector<1x8x128xf32>
    %cst = arith.constant dense<0.000000e+00> : vector<1x128xf32>
    %7 = vector.multi_reduction <add>, %6, %cst [1] : vector<1x8x128xf32> to vector<1x128xf32>
    %8 = vector.shape_cast %7 : vector<1x128xf32> to vector<1x1x128xf32>
    %9 = arith.addf %5, %8 : vector<1x1x128xf32>
    %c0_9 = arith.constant 0 : index
    %c0_10 = arith.constant 0 : index
    %c0_11 = arith.constant 0 : index
    %10 = vector.load %arg5[%c0_9, %c0_10, %c0_11] : memref<1x1x128xf32, #tpu.memory_space<vmem>>, vector<1x1x128xf32>
    tpu.vector_store %arg5[%c0_9, %c0_10, %c0_11], %9 {strides = array<i32>} : memref<1x1x128xf32, #tpu.memory_space<vmem>>, vector<1x1x128xf32>,
    %c0_12 = arith.constant 0 : index
    %c0_13 = arith.constant 0 : index
    %c0_14 = arith.constant 0 : index
    %11 = vector.load %arg6[%c0_12, %c0_13, %c0_14] : memref<1x1x128xf32, #tpu.memory_space<vmem>>, vector<1x1x128xf32>
    %cst_15 = arith.constant dense<0.000000e+00> : vector<1x128xf32>
    %12 = vector.multi_reduction <add>, %3, %cst_15 [1] : vector<1x8x128xf32> to vector<1x128xf32>
    %13 = vector.shape_cast %12 : vector<1x128xf32> to vector<1x1x128xf32>
    %cst_16 = arith.constant dense<0.000000e+00> : vector<1x128xf32>
    %14 = vector.multi_reduction <add>, %4, %cst_16 [1] : vector<1x8x128xf32> to vector<1x128xf32>
    %15 = vector.shape_cast %14 : vector<1x128xf32> to vector<1x1x128xf32>
    %16 = arith.addf %13, %15 : vector<1x1x128xf32>
    %17 = arith.addf %11, %16 : vector<1x1x128xf32>
    %c0_17 = arith.constant 0 : index
    %c0_18 = arith.constant 0 : index
    %c0_19 = arith.constant 0 : index
    %18 = vector.load %arg6[%c0_17, %c0_18, %c0_19] : memref<1x1x128xf32, #tpu.memory_space<vmem>>, vector<1x1x128xf32>
    tpu.vector_store %arg6[%c0_17, %c0_18, %c0_19], %17 {strides = array<i32>} : memref<1x1x128xf32, #tpu.memory_space<vmem>>, vector<1x1x128xf32>,
    %c0_i32_20 = arith.constant 0 : i32
    %19 = arith.cmpi eq, %arg1, %c0_i32_20 : i32
    %20 = arith.extui %19 : i1 to i32
    %c0_i32_21 = arith.constant 0 : i32
    %21 = arith.cmpi ne, %20, %c0_i32_21 : i32
    scf.if %21 {
      %c0_22 = arith.constant 0 : index
      %c0_23 = arith.constant 0 : index
      %c0_24 = arith.constant 0 : index
      %22 = vector.load %arg5[%c0_22, %c0_23, %c0_24] : memref<1x1x128xf32, #tpu.memory_space<vmem>>, vector<1x1x128xf32>
      %cst_25 = arith.constant dense<0.000000e+00> : vector<1x1xf32>
      %23 = vector.multi_reduction <add>, %22, %cst_25 [2] : vector<1x1x128xf32> to vector<1x1xf32>
      %24 = vector.shape_cast %23 : vector<1x1xf32> to vector<1x1x1xf32>
      %c0_26 = arith.constant 0 : index
      %c0_27 = arith.constant 0 : index
      %c0_28 = arith.constant 0 : index
      %25 = vector.load %arg6[%c0_26, %c0_27, %c0_28] : memref<1x1x128xf32, #tpu.memory_space<vmem>>, vector<1x1x128xf32>
      %cst_29 = arith.constant dense<0.000000e+00> : vector<1x1xf32>
      %26 = vector.multi_reduction <add>, %25, %cst_29 [2] : vector<1x1x128xf32> to vector<1x1xf32>
      %27 = vector.shape_cast %26 : vector<1x1xf32> to vector<1x1x1xf32>
      %cst_30 = arith.constant 9.99999974E-6 : f32
      %28 = vector.broadcast %cst_30 : f32 to vector<1x1x1xf32>
      %29 = arith.addf %27, %28 : vector<1x1x1xf32>
      %cst_31 = arith.constant 2.000000e+00 : f32
      %30 = vector.broadcast %cst_31 : f32 to vector<1x1x1xf32>
      %31 = arith.mulf %30, %24 : vector<1x1x1xf32>
      %32 = arith.divf %31, %29 : vector<1x1x1xf32>
      %c0_32 = arith.constant 0 : index
      %c0_33 = arith.constant 0 : index
      %c0_34 = arith.constant 0 : index
      %33 = vector.load %arg4[%c0_32, %c0_33, %c0_34] : memref<1x1x1xf32, #tpu.memory_space<vmem>>, vector<1x1x1xf32>
      tpu.vector_store %arg4[%c0_32, %c0_33, %c0_34], %32 {strides = array<i32>} : memref<1x1x1xf32, #tpu.memory_space<vmem>>, vector<1x1x1xf32>,
    } else {
    }
    return
  }
  func.func @transform_0(%arg0: i32, %arg1: i32) -> (i32, i32, i32) {
    %c0_i32 = arith.constant 0 : i32
    %c0_i32_0 = arith.constant 0 : i32
    return %arg0, %arg1, %c0_i32 : i32, i32, i32
  }
  func.func @transform_1(%arg0: i32, %arg1: i32) -> (i32, i32, i32) {
    %c0_i32 = arith.constant 0 : i32
    %c0_i32_0 = arith.constant 0 : i32
    return %arg0, %arg1, %c0_i32 : i32, i32, i32
  }
  func.func @transform_2(%arg0: i32, %arg1: i32) -> (i32, i32, i32) {
    %c0_i32 = arith.constant 0 : i32
    %c0_i32_0 = arith.constant 0 : i32
    %c0_i32_1 = arith.constant 0 : i32
    return %arg0, %c0_i32, %c0_i32_0 : i32, i32, i32
  }
}

</mosaic_0001>

<bundles_post_ra>
// kernel: _batch_soft_iou_impl.1
= control target key start
LH: loop header
LB: loop body
LE: loop exit
PB: predicated region body
PF: predicated region fallthrough
CT: control target
= control target key end

     0   :  { %s389_s9 = smov 0   ;;  %s391_s10 = smov 0   ;;  %s429_s0 = inlined_call_operand.vmem [shape: f32[2,8,128], index: 0, kind: input, shape index: {}]   ;;  %s430_s1 = inlined_call_operand.vmem [shape: f32[2,8,128], index: 1, kind: input, shape index: {}]   ;;  %s431_s2 = inlined_call_operand.vmem [shape: f32[2,1,1], index: 2, kind: output, shape index: {}]  }
   0x1   :  { %s393_s11 = smov 0  }
   0x2 LB: > { %s24_s12 = sadd.s32 1, %s367_s10  ;;  %p317_p0 = scmp.ge.s32.totalorder %s371_s11, 1  ;;  %s371_s11 = sphi %s393_s11, %s12_s11   ;;  %s367_s10 = sphi %s391_s10, %s433_s10   ;;  %s363_s9 = sphi %s389_s9, %s432_s9  }
   0x3   : > { %p26_p1 = scmp.ge.s32.totalorder %s24_s12, 2  ;;  %p142_p2 = scmp.lt.s32.totalorder %s371_s11, 3 }
   0x5   : > { %s435_s12 = smov (%p26_p1, %s24_s12), 0  ;;  %p143_p3 = pnand %p317_p0, %p142_p2 }
   0x6   : > { %p171_p4 = scmp.lt.s32.totalorder (!%p143_p3), %s363_s9, 1  ;;  %v373_v0 = vmov (!%p143_p3), 0.0   ;;  %vm226_vm0 = vcmask (!%p143_p3), 1040384   ;;  %vm238_vm1 = vcmask (!%p143_p3), 0  }
   0x7   : > { %146 = sbr.rel (%p143_p3) target bundleno = 202 (0xca), region = 28  ;;  %193 = vst [vmem:[#allocation3] sm:$0x1] (!%p143_p3), %v373_v0  ;;  %192 = vst [vmem:[#allocation2] sm:$0x1] (!%p143_p3), %v373_v0 }
   0xe   : > { %s437_s9 = smov (!%p171_p4, %s363_s9), 1  ;;  %v206_v21 = vld [vmem:[#allocation3] sm:$0x1]  ;;  %v196_v22 = vld [vmem:[#allocation2] sm:$0x1] }
   0xf   : > { %s318_s13 = sshll.u32 %s437_s9, 3  ;;  %s187_s22 = scalar_lea.vmem %s431_s2, %s437_s9 }
  0x10   : > { %s177_s16 = scalar_lea.vmem %s429_s0, %s318_s13  ;;  %s184_s19 = scalar_lea.vmem %s430_s1, %s318_s13 }
  0x11   : > { %v194_v1 = vld [vmem:[%s177_s16] sm:$0xff] }
  0x12   : > { %v195_v2 = vld [vmem:[%s184_s19] sm:$0xff]  ;;  %v207_v3 = vrot.slane %v194_v1, 4 }
  0x13   : > { %v213_v4 = vrot.slane %v195_v2, 4  ;;  %v197_v5 = vmul.f32 %v195_v2, %v194_v1 }
  0x14   : > { %v208_v6 = vadd.f32 %v207_v3, %v194_v1 }
  0x15   : > { %v214_v7 = vadd.f32 %v213_v4, %v195_v2  ;;  %v198_v8 = vrot.slane %v197_v5, 4 }
  0x16   : > { %v209_v9 = vrot.slane %v208_v6, 2 }
  0x17   : > { %v215_v10 = vrot.slane %v214_v7, 2  ;;  %v199_v11 = vadd.f32 %v198_v8, %v197_v5 }
  0x18   : > { %v210_v12 = vadd.f32 %v209_v9, %v208_v6 }
  0x19   : > { %v216_v13 = vadd.f32 %v215_v10, %v214_v7  ;;  %v200_v14 = vrot.slane %v199_v11, 2 }
  0x1a   : > { %v211_v15 = vrot.slane %v210_v12, 1 }
  0x1b   : > { %v217_v16 = vrot.slane %v216_v13, 1  ;;  %v201_v17 = vadd.f32 %v200_v14, %v199_v11 }
  0x1c   : > { %v212_v18 = vadd.f32 %v211_v15, %v210_v12 }
  0x1d   : > { %v218_v19 = vadd.f32 %v217_v16, %v216_v13  ;;  %v202_v20 = vrot.slane %v201_v17, 1 }
  0x1f   : > { %v219_v23 = vadd.f32 %v218_v19, %v212_v18  ;;  %v203_v24 = vadd.f32 %v202_v20, %v201_v17 }
  0x21   : > { %v220_v25 = vadd.f32 %v219_v23, %v206_v21  ;;  %v204_v26 = vadd.f32 %v203_v24, %v196_v22 }
  0x23   : > { %221 = vst [vmem:[#allocation3] sm:$0x1] %v220_v25  ;;  %205 = vst [vmem:[#allocation2] sm:$0x1] %v204_v26 }
  0x2a   : > { %v230_v27 = vld [vmem:[#allocation3] sm:$0x1]  ;;  %v225_v28 = vld [vmem:[#allocation2] sm:$0x1] }
  0x2b   : > { %v231_v29 = vsel %vm226_vm0, %v230_v27, 0.0  ;;  %v227_v30 = vsel %vm226_vm0, %v225_v28, 0.0 }
  0x2c   : > { %232 = vadd.xlane.f32.xlu0 %v231_v29 }
  0x30   : > { %228 = vadd.xlane.f32.xlu0 %v227_v30 }
  0xb9   : > { %v233_v31 = vpop.xlane.xlu0 %232 }
  0xba   : > { %v234_v32 = vadd.f32 1e-05, %v233_v31 }
  0xbc   : > { %347 = vrcp.f32 %v234_v32 }
  0xbd   : > { %v229_v33 = vpop.xlane.xlu0 %228 }
  0xbe   : > { %v235_v34 = vmul.f32 2.0, %v229_v33 }
  0xc6   : > { %v348_v35 = vpop.eup %347 }
  0xc7   : > { %v237_v36 = vmul.f32 %v348_v35, %v235_v34 }
  0xc9   : > { %239 = vst.msk [vmem:[%s187_s22] sm:$0x1] %vm238_vm1, %v237_v36 }
  0xca PF: > { %s12_s11 = sadd.s32 1, %s371_s11   ;;  %s432_s9 = smov %s367_s10 }
  0xcb   : > { %p9_p5 = scmp.ge.s32.totalorder %s12_s11, 4   ;;  %s433_s10 = smov %s435_s12 }
  0xcd   :  { %11 = sbr.rel (!%p9_p5) target bundleno = 2 (0x2), region = 69 }

</bundles_post_ra>
